<compile_context>
chip_gen: v7x
topology: tpu7x:2x2x1
jax: 0.10.0
libtpu: 0.0.40
codegen_flags: <defaults>
</compile_context>

<pallas_src>
import functools
import math

import jax
import jax.numpy as jnp
from jax.experimental import pallas as pl
from jax.experimental.pallas import tpu as pltpu

_LANES = 128
_MAX_BLOCK_ROWS = 1024          # 1024 x 128 x 4 B = 512 KiB per input DMA step


def _bce_block_kernel(total_elems: int, block_rows: int,
                      tgt_ref, x_ref, part_ref):
    """One row-block: elementwise stable BCE-with-logits + per-block partial sum."""
    i = pl.program_id(0)

    t = tgt_ref[...]                                # (1, 128), broadcasts over rows
    x = x_ref[...].astype(jnp.float32)              # (block_rows, 128)

    # Stable BCEWithLogits: max(x, 0) - x*t + log1p(exp(-|x|))
    loss = jnp.maximum(x, 0.0) - x * t + jnp.log1p(jnp.exp(-jnp.abs(x)))

    # Mask out padded tail elements (global flat index >= total_elems).
    row = jax.lax.broadcasted_iota(jnp.int32, x.shape, 0)
    lane = jax.lax.broadcasted_iota(jnp.int32, x.shape, 1)
    gidx = (i * block_rows + row) * _LANES + lane
    loss = jnp.where(gidx < total_elems, loss, 0.0)

    # Pure-VPU partial reduction: collapse sublane groups -> one (8, 128) tile.
    part_ref[0] = jnp.sum(loss.reshape(block_rows // 8, 8, _LANES), axis=0)


@jax.jit
def _bce_impl(output: jax.Array, target_row: jax.Array) -> jax.Array:
    total = math.prod(output.shape)

    rows = pl.cdiv(total, _LANES)
    rows = ((rows + 7) // 8) * 8                                # sublane multiple
    block_rows = min(_MAX_BLOCK_ROWS, rows)
    rows_pad = ((rows + block_rows - 1) // block_rows) * block_rows
    num_blocks = rows_pad // block_rows

    x = output.reshape(-1)
    pad = rows_pad * _LANES - total
    if pad:                                                     # free when it divides evenly
        x = jnp.pad(x, (0, pad))
    x = x.reshape(rows_pad, _LANES)

    kernel = functools.partial(_bce_block_kernel, total, block_rows)

    partials = pl.pallas_call(
        kernel,
        out_shape=jax.ShapeDtypeStruct((num_blocks, 8, _LANES), jnp.float32),
        grid=(num_blocks,),
        in_specs=[
            pl.BlockSpec((1, _LANES), lambda i: (0, 0)),            # target row (VMEM)
            pl.BlockSpec((block_rows, _LANES), lambda i: (i, 0)),   # data rows
        ],
        out_specs=pl.BlockSpec((1, 8, _LANES), lambda i: (i, 0, 0)),
        compiler_params=pltpu.CompilerParams(
            dimension_semantics=("parallel",)),
    )(target_row, x)

    return jnp.sum(partials) / jnp.float32(total)


def bce(output: jax.Array, target: float | jax.Array = 0.0) -> jax.Array:
    """Pallas equivalent of BCE.forward(output): BCEWithLogitsLoss(output, target*ones)."""
    target_row = jnp.full((1, _LANES), target, dtype=jnp.float32)
    return _bce_impl(output, target_row)


def _reference(output, target):
    """Independent pure-JAX reference: -(t*log_sigmoid(x) + (1-t)*log_sigmoid(-x)), mean."""
    x = output.astype(jnp.float32)
    t = jnp.float32(target)
    return jnp.mean(-(t * jax.nn.log_sigmoid(x) + (1.0 - t) * jax.nn.log_sigmoid(-x)))


if __name__ == "__main__":
    key = jax.random.PRNGKey(0)
    k1, k2 = jax.random.split(key)

    # Default module construction: BCE(target=0), NCHW logits.
    x1 = jax.random.normal(k1, (2, 4, 16, 16), dtype=jnp.float32)
    res1 = jax.block_until_ready(bce(x1, 0.0))
    ref1 = _reference(x1, 0.0)
    assert jnp.allclose(res1, ref1, rtol=1e-5, atol=1e-6), (res1, ref1)

    # Non-default target and a shape that does not divide the 128-lane flattening.
    x2 = jax.random.normal(k2, (2, 3, 7, 19), dtype=jnp.float32)
    res2 = jax.block_until_ready(bce(x2, 0.7))
    ref2 = _reference(x2, 0.7)
    assert jnp.allclose(res2, ref2, rtol=1e-5, atol=1e-6), (res2, ref2)

    print("KERNEL_OK")
</pallas_src>

<mosaic_0001>
module attributes {stable_mosaic.version = 11 : i64} {
  func.func @_bce_block_kernel(%arg0: i32, %arg1: memref<1x128xf32, #tpu.memory_space<vmem>>, %arg2: memref<16x128xf32, #tpu.memory_space<vmem>>, %arg3: memref<1x8x128xf32, #tpu.memory_space<vmem>>) attributes {dimension_semantics = [#tpu.dimension_semantics<parallel>], iteration_bounds = array<i64: 1>, scalar_prefetch = 0 : i64, scratch_operands = 0 : i64, tpu.core_type = #tpu.core_type<tc>, window_params = [{pipeline_mode = #tpu.pipeline_mode<synchronous>, transform_indices = @transform_0, window_bounds = array<i64: 1, 128>}, {transform_indices = @transform_1, window_bounds = array<i64: 16, 128>}, {transform_indices = @transform_2, window_bounds = array<i64: 1, 8, 128>}]} {
    %c0 = arith.constant 0 : index
    %c0_0 = arith.constant 0 : index
    %0 = vector.load %arg1[%c0, %c0_0] : memref<1x128xf32, #tpu.memory_space<vmem>>, vector<1x128xf32>
    %c0_1 = arith.constant 0 : index
    %c0_2 = arith.constant 0 : index
    %1 = vector.load %arg2[%c0_1, %c0_2] : memref<16x128xf32, #tpu.memory_space<vmem>>, vector<16x128xf32>
    %cst = arith.constant 0.000000e+00 : f32
    %2 = vector.broadcast %cst : f32 to vector<16x128xf32>
    %3 = arith.maximumf %1, %2 : vector<16x128xf32>
    %4 = vector.broadcast %0 : vector<1x128xf32> to vector<16x128xf32>
    %5 = arith.mulf %1, %4 : vector<16x128xf32>
    %6 = arith.subf %3, %5 : vector<16x128xf32>
    %7 = math.absf %1 : vector<16x128xf32>
    %cst_3 = arith.constant 0.000000e+00 : f32
    %8 = vector.broadcast %cst_3 : f32 to vector<16x128xf32>
    %9 = arith.subf %8, %7 : vector<16x128xf32>
    %10 = math.exp %9 : vector<16x128xf32>
    %11 = math.log1p %10 : vector<16x128xf32>
    %12 = arith.addf %6, %11 : vector<16x128xf32>
    %13 = tpu.iota {dimensions = array<i32: 0>} : vector<16x128xi32>
    %14 = tpu.iota {dimensions = array<i32: 1>} : vector<16x128xi32>
    %c16_i32 = arith.constant 16 : i32
    %15 = arith.muli %arg0, %c16_i32 : i32
    %16 = vector.broadcast %15 : i32 to vector<16x128xi32>
    %17 = arith.addi %16, %13 : vector<16x128xi32>
    %c128_i32 = arith.constant 128 : i32
    %18 = vector.broadcast %c128_i32 : i32 to vector<16x128xi32>
    %19 = arith.muli %17, %18 : vector<16x128xi32>
    %20 = arith.addi %19, %14 : vector<16x128xi32>
    %c2048_i32 = arith.constant 2048 : i32
    %21 = vector.broadcast %c2048_i32 : i32 to vector<16x128xi32>
    %22 = arith.cmpi slt, %20, %21 : vector<16x128xi32>
    %cst_4 = arith.constant 0.000000e+00 : f32
    %23 = vector.broadcast %cst_4 : f32 to vector<16x128xf32>
    %24 = arith.select %22, %12, %23 : vector<16x128xi1>, vector<16x128xf32>
    %25 = vector.shape_cast %24 : vector<16x128xf32> to vector<2x8x128xf32>
    %cst_5 = arith.constant dense<0.000000e+00> : vector<8x128xf32>
    %26 = vector.multi_reduction <add>, %25, %cst_5 [0] : vector<2x8x128xf32> to vector<8x128xf32>
    %c0_6 = arith.constant 0 : index
    %c0_7 = arith.constant 0 : index
    %c0_8 = arith.constant 0 : index
    %27 = vector.load %arg3[%c0_6, %c0_7, %c0_8] : memref<1x8x128xf32, #tpu.memory_space<vmem>>, vector<1x8x128xf32>
    %28 = vector.shape_cast %27 : vector<1x8x128xf32> to vector<8x128xf32>
    %29 = vector.shape_cast %26 : vector<8x128xf32> to vector<1x8x128xf32>
    tpu.vector_store %arg3[%c0_6, %c0_7, %c0_8], %29 {strides = array<i32>} : memref<1x8x128xf32, #tpu.memory_space<vmem>>, vector<1x8x128xf32>,
    return
  }
  func.func @transform_0(%arg0: i32) -> (i32, i32) {
    %c0_i32 = arith.constant 0 : i32
    %c0_i32_0 = arith.constant 0 : i32
    %c0_i32_1 = arith.constant 0 : i32
    return %c0_i32, %c0_i32_0 : i32, i32
  }
  func.func @transform_1(%arg0: i32) -> (i32, i32) {
    %c0_i32 = arith.constant 0 : i32
    %c0_i32_0 = arith.constant 0 : i32
    return %arg0, %c0_i32 : i32, i32
  }
  func.func @transform_2(%arg0: i32) -> (i32, i32, i32) {
    %c0_i32 = arith.constant 0 : i32
    %c0_i32_0 = arith.constant 0 : i32
    %c0_i32_1 = arith.constant 0 : i32
    return %arg0, %c0_i32, %c0_i32_0 : i32, i32, i32
  }
}

</mosaic_0001>

<bundles_post_ra>
// kernel: _bce_impl.1
= control target key start
LH: loop header
LB: loop body
LE: loop exit
PB: predicated region body
PF: predicated region fallthrough
CT: control target
= control target key end

     0   :  { %v54_v8 = vlaneseq  ;;  %s113_s1 = inlined_call_operand.vmem [shape: f32[16,128], index: 1, kind: input, shape index: {}]   ;;  %s114_s0 = inlined_call_operand.vmem [shape: f32[1,128], index: 0, kind: input, shape index: {}]   ;;  %s115_s2 = inlined_call_operand.vmem [shape: f32[1,8,128], index: 2, kind: output, shape index: {}]  }
   0x1   :  { %v12_v0 = vld [vmem:[%s113_s1] sm:$0xff]  ;;  %v13_v1 = vld [vmem:[%s113_s1 + $0x8] sm:$0xff] }
   0x2   :  { %v26_v2 = vand.u32 2147483647, %v12_v0  ;;  %v27_v3 = vand.u32 2147483647, %v13_v1  ;;  %v55_v12 = vshrl.u32 %v54_v8, 7  ;;  %v14_v18 = vmax.f32 %v12_v0, 0.0 }
   0x3   :  { %v77_v17 = vld [vmem:[%s114_s0] ss:$0 sm:$0xff]  ;;  %v58_v20 = vand.u32 127, %v54_v8  ;;  %v15_v26 = vmax.f32 %v13_v1, 0.0 }
   0x4   :  { %v28_v4 = vsub.f32 0.0, %v26_v2  ;;  %v29_v5 = vsub.f32 0.0, %v27_v3  ;;  %v56_v16 = vadd.s32 8, %v55_v12  ;;  %v63_v21 = vmul.u32 128, %v55_v12 }
   0x5   :  { %v22_v22 = vmul.f32 %v77_v17, %v12_v0  ;;  %v23_v27 = vmul.f32 %v77_v17, %v13_v1 }
   0x6   :  { %v30_v6 = vmul.f32 1.442695, %v28_v4  ;;  %v32_v7 = vmul.f32 1.442695, %v29_v5  ;;  %v64_v25 = vmul.u32 128, %v56_v16  ;;  %v65_v30 = vadd.s32 %v63_v21, %v58_v20 }
   0x7   :  { %v24_v32 = vsub.f32 %v14_v18, %v22_v22  ;;  %v25_v36 = vsub.f32 %v15_v26, %v23_v27 }
   0x8   :  { %78 = vpow2.f32 %v30_v6  ;;  %v66_v34 = vadd.s32 %v64_v25, %v58_v20  ;;  %vm67_vm2 = vcmp.lt.s32.totalorder %v65_v30, 2048 }
   0x9   :  { %80 = vpow2.f32 %v32_v7 }
   0xa   :  { %vm68_vm3 = vcmp.lt.s32.totalorder %v66_v34, 2048 }
  0x12   :  { %v79_v9 = vpop.eup %78 }
  0x13   :  { %v81_v10 = vpop.eup %80  ;;  %v34_v11 = vadd.f32 1.0, %v79_v9  ;;  %v37_v14 = vmul.f32 -0.5, %v79_v9  ;;  %v40_v23 = vand.u32 2147483647, %v79_v9 }
  0x14   :  { %v43_v13 = vadd.f32 1.0, %v81_v10  ;;  %v46_v15 = vmul.f32 -0.5, %v81_v10  ;;  %v49_v28 = vand.u32 2147483647, %v81_v10 }
  0x15   :  { %82 = vlog2.f32 %v34_v11  ;;  %v38_v19 = vadd.f32 1.0, %v37_v14  ;;  %vm41_vm0 = vcmp.lt.f32.partialorder %v40_v23, 0.0004427343 }
  0x16   :  { %84 = vlog2.f32 %v43_v13  ;;  %v47_v24 = vadd.f32 1.0, %v46_v15  ;;  %vm50_vm1 = vcmp.lt.f32.partialorder %v49_v28, 0.0004427343 }
  0x17   :  { %v39_v29 = vmul.f32 %v79_v9, %v38_v19 }
  0x18   :  { %v48_v33 = vmul.f32 %v81_v10, %v47_v24 }
  0x1f   :  { %v83_v31 = vpop.eup %82 }
  0x20   :  { %v85_v35 = vpop.eup %84  ;;  %v36_v37 = vmul.f32 0.6931472, %v83_v31 }
  0x21   :  { %v45_v38 = vmul.f32 0.6931472, %v85_v35 }
  0x22   :  { %v42_v39 = vsel %vm41_vm0, %v39_v29, %v36_v37 }
  0x23   :  { %v51_v40 = vsel %vm50_vm1, %v48_v33, %v45_v38  ;;  %v52_v41 = vadd.f32 %v42_v39, %v24_v32 }
  0x24   :  { %v53_v42 = vadd.f32 %v51_v40, %v25_v36 }
  0x25   :  { %v69_v43 = vsel %vm67_vm2, %v52_v41, 0.0 }
  0x26   :  { %v70_v44 = vsel %vm68_vm3, %v53_v42, 0.0 }
  0x27   :  { %v71_v45 = vadd.f32 %v70_v44, %v69_v43 }
  0x29   :  { %72 = vst [vmem:[%s115_s2] sm:$0xff] %v71_v45 }

</bundles_post_ra>
